<compile_context>
chip_gen: v6e
topology: v6e:2x2x1
jax: 0.10.0
libtpu: 0.0.40
codegen_flags: <defaults>
</compile_context>

<pallas_src>
import jax
import jax.numpy as jnp
from jax import lax
from jax.experimental import pallas as pl
from jax.experimental.pallas import tpu as pltpu


def _round_up(x: int, m: int) -> int:
    return ((x + m - 1) // m) * m


def _mean_pool_head_kernel(hid_ref, mask_ref, w_ref, b_ref, out_ref,
                           sum_emb_ref, sum_mask_ref):
    """Grid (batch_tiles, seq_tiles); seq axis (last) is the reduction.

    hid_ref  : (TB, TS, H)  native dtype (e.g. bf16)
    mask_ref : (TB, 1, TS)  same dtype as hid (0/1, exact in bf16)
    w_ref    : (H, Cp)      bf16  (folded fc1 @ fc2)
    b_ref    : (1, Cp)      f32   (folded bias)
    out_ref  : (TB, Cp)     f32
    sum_emb_ref  : (TB, 1, H) f32 scratch
    sum_mask_ref : (TB, 1, 1) f32 scratch
    """
    si = pl.program_id(1)

    @pl.when(si == 0)
    def _init():
        sum_emb_ref[...] = jnp.zeros_like(sum_emb_ref)
        sum_mask_ref[...] = jnp.zeros_like(sum_mask_ref)

    m = mask_ref[...]                                          # (TB, 1, TS)

    # MeanPooling accumulation on the MXU:
    #   sum(hidden * mask, dim=1)  ==  (TB,1,TS) x (TB,TS,H) -> (TB,1,H)
    sum_emb_ref[...] += jnp.einsum(
        'bqs,bsh->bqh', m, hid_ref[...],
        preferred_element_type=jnp.float32)                    # (TB, 1, H)
    # sum(mask, dim=1) — tiny lane reduction on the VPU/XLU.
    sum_mask_ref[...] += jnp.sum(m.astype(jnp.float32), axis=2,
                                 keepdims=True)                 # (TB, 1, 1)

    @pl.when(si == pl.num_programs(1) - 1)
    def _finalize():
        denom = jnp.maximum(sum_mask_ref[...], 1e-9)            # clamp(min=1e-9)
        feat = jnp.sum(sum_emb_ref[...] / denom, axis=1)        # (TB, H) f32
        out_ref[...] = (
            jnp.dot(feat.astype(w_ref.dtype), w_ref[...],
                    preferred_element_type=jnp.float32)
            + b_ref[...]
        )


def frozenbert_head(last_hidden_state, attention_mask, w1, b1, w2, b2):
    """Wrapper. w1: [256, H], b1: [256], w2: [C, 256], b2: [C] (nn.Linear conv.)."""
    B, S, H = last_hidden_state.shape
    C = w2.shape[0]
    hid_dtype = last_hidden_state.dtype
    hid_itemsize = jnp.dtype(hid_dtype).itemsize

    # ---- fold the activation-free 2-layer head: out = feat @ W + b ----------
    w1f = w1.astype(jnp.float32)
    w2f = w2.astype(jnp.float32)
    w_comb = jnp.dot(w1f.T, w2f.T, precision=jax.lax.Precision.HIGHEST)  # (H, C)
    b_comb = (jnp.dot(b1.astype(jnp.float32), w2f.T,
                      precision=jax.lax.Precision.HIGHEST)
              + b2.astype(jnp.float32))

    # Lane-dense output: pad class dim to a multiple of 128. Folded weight is
    # stored in bf16 (MXU-native, half the resident VMEM); bias stays f32.
    Cp = _round_up(max(C, 1), 128)
    w_pad = jnp.zeros((H, Cp), jnp.bfloat16).at[:, :C].set(
        w_comb.astype(jnp.bfloat16))
    b_pad = jnp.zeros((1, Cp), jnp.float32).at[0, :C].set(b_comb)

    # ---- per-generation VMEM budgets ----------------------------------------
    try:
        vmem_cap = int(getattr(pltpu.get_tpu_info(), "vmem_capacity_bytes",
                               64 * 1024 * 1024))
    except Exception:
        vmem_cap = 64 * 1024 * 1024             # conservative (v7x per-TC VMEM)
    vmem_limit = min((vmem_cap * 3) // 4, 96 * 1024 * 1024)  # 48MB v7x, 96MB v5e/v6e
    hid_tile_budget = vmem_limit // 4           # per hid buffer (double-buffered)

    # ---- tile sizing ---------------------------------------------------------
    s_gran = 16 if hid_itemsize == 2 else 8     # bf16 packs 16 rows / sublane group
    TS = _round_up(S, s_gran) if S <= 1024 else 1024
    TB = min(_round_up(B, 8), 128)
    while TB > 8 and TB * TS * H * hid_itemsize > hid_tile_budget:
        TB = _round_up(TB // 2, 8)
    while TS > 128 and TB * TS * H * hid_itemsize > hid_tile_budget:
        TS = _round_up(TS // 2, 128)            # keeps a legal lane/sublane tile
    # v7x: make sure the batch grid spans both TensorCores whenever B allows.
    while TB > 8 and _round_up(B, TB) // TB < 2:
        TB = _round_up(TB // 2, 8)

    Bp = _round_up(B, TB)
    Sp = _round_up(S, TS)

    # ---- pad inputs (zeros in the mask make padded rows/steps no-ops) -------
    hid = last_hidden_state                      # keep native dtype (bf16) in HBM
    mask = attention_mask.astype(hid_dtype)      # 0/1 exact in bf16; halves DMA
    if (Bp, Sp) != (B, S):
        hid = jnp.pad(hid, ((0, Bp - B), (0, Sp - S), (0, 0)))
        mask = jnp.pad(mask, ((0, Bp - B), (0, Sp - S)))
    mask3 = mask.reshape(Bp, 1, Sp)              # q=1 layout for the MXU pooling

    grid = (Bp // TB, Sp // TS)

    cost = pl.CostEstimate(
        flops=2 * Bp * Sp * H + 2 * Bp * H * Cp,
        transcendentals=0,
        bytes_accessed=(Bp * Sp * H * hid_itemsize        # hidden states
                        + Bp * Sp * hid_itemsize          # mask
                        + H * Cp * 2 + Cp * 4             # folded weight + bias
                        + Bp * Cp * 4),                   # output
    )

    out_padded = pl.pallas_call(
        _mean_pool_head_kernel,
        out_shape=jax.ShapeDtypeStruct((Bp, Cp), jnp.float32),
        grid_spec=pltpu.PrefetchScalarGridSpec(
            num_scalar_prefetch=0,
            grid=grid,
            in_specs=[
                pl.BlockSpec((TB, TS, H), lambda bi, si: (bi, si, 0)),
                pl.BlockSpec((TB, 1, TS), lambda bi, si: (bi, 0, si)),
                pl.BlockSpec((H, Cp), lambda bi, si: (0, 0)),   # resident weights
                pl.BlockSpec((1, Cp), lambda bi, si: (0, 0)),   # resident bias
            ],
            out_specs=pl.BlockSpec((TB, Cp), lambda bi, si: (bi, 0)),
            scratch_shapes=[
                pltpu.VMEM((TB, 1, H), jnp.float32),   # sum_embeddings accumulator
                pltpu.VMEM((TB, 1, 1), jnp.float32),   # sum_mask accumulator
            ],
        ),
        compiler_params=pltpu.CompilerParams(
            dimension_semantics=("parallel", "arbitrary"),
            vmem_limit_bytes=vmem_limit,
        ),
        cost_estimate=cost,
    )(hid, mask3, w_pad, b_pad)

    return out_padded[:B, :C]


def reference(last_hidden_state, attention_mask, w1, b1, w2, b2):
    """Pure-JAX reference reproducing the PyTorch forward exactly."""
    hid = last_hidden_state.astype(jnp.float32)
    m = attention_mask.astype(jnp.float32)[:, :, None]
    sum_emb = jnp.sum(hid * m, axis=1)
    sum_mask = jnp.maximum(jnp.sum(m, axis=1), 1e-9)   # torch.clamp(min=1e-9)
    feat = sum_emb / sum_mask
    h1 = feat @ w1.astype(jnp.float32).T + b1.astype(jnp.float32)
    return h1 @ w2.astype(jnp.float32).T + b2.astype(jnp.float32)


if __name__ == "__main__":
    # Small shapes consistent with the module's forward.
    B, S, H = 2, 8, 32          # batch, seq_len, encoder hidden_size
    HID, C = 256, 6             # fc hidden, num_classes
    initializer_range = 0.02    # model_config.initializer_range

    key = jax.random.PRNGKey(0)
    k_hid, k_mask, k_w1, k_w2 = jax.random.split(key, 4)

    # Encoder output in its native bf16 (kept bf16 in HBM; consumed by the MXU).
    last_hidden_state = jax.random.normal(k_hid, (B, S, H)).astype(jnp.bfloat16)
    # attention mask with some padded positions (1 = keep, 0 = pad)
    attention_mask = (jax.random.uniform(k_mask, (B, S)) > 0.25).astype(jnp.float32)

    # _init_weights: normal(mean=0, std=initializer_range), bias = 0
    w1 = initializer_range * jax.random.normal(k_w1, (HID, H), dtype=jnp.float32)
    b1 = jnp.zeros((HID,), dtype=jnp.float32)
    w2 = initializer_range * jax.random.normal(k_w2, (C, HID), dtype=jnp.float32)
    b2 = jnp.zeros((C,), dtype=jnp.float32)

    out = frozenbert_head(last_hidden_state, attention_mask, w1, b1, w2, b2)
    out = jax.block_until_ready(out)

    ref = reference(last_hidden_state, attention_mask, w1, b1, w2, b2)
    assert out.shape == (B, C)
    # Folding the two activation-free Linears (and bf16 folded weights) slightly
    # reorders f32 accumulation; tolerance covers it.
    assert jnp.allclose(out, ref, atol=1e-3, rtol=1e-3), (
        f"max abs err {jnp.max(jnp.abs(out - ref))}")

    print("KERNEL_OK")
</pallas_src>

<mosaic_0001>
module attributes {stable_mosaic.version = 11 : i64} {
  func.func @_mean_pool_head_kernel(%arg0: i32, %arg1: i32, %arg2: memref<8x16x32xbf16, #tpu.memory_space<vmem>>, %arg3: memref<8x1x16xbf16, #tpu.memory_space<vmem>>, %arg4: memref<32x128xbf16, #tpu.memory_space<vmem>>, %arg5: memref<1x128xf32, #tpu.memory_space<vmem>>, %arg6: memref<8x128xf32, #tpu.memory_space<vmem>>, %arg7: memref<8x1x32xf32, #tpu.memory_space<vmem>>, %arg8: memref<8x1x1xf32, #tpu.memory_space<vmem>>) attributes {dimension_semantics = [#tpu.dimension_semantics<parallel>, #tpu.dimension_semantics<arbitrary>], iteration_bounds = array<i64: 1, 1>, scalar_prefetch = 0 : i64, scratch_operands = 2 : i64, tpu.core_type = #tpu.core_type<tc>, window_params = [{transform_indices = @transform_0, window_bounds = array<i64: 8, 16, 32>}, {transform_indices = @transform_1, window_bounds = array<i64: 8, 1, 16>}, {pipeline_mode = #tpu.pipeline_mode<synchronous>, transform_indices = @transform_2, window_bounds = array<i64: 32, 128>}, {pipeline_mode = #tpu.pipeline_mode<synchronous>, transform_indices = @transform_3, window_bounds = array<i64: 1, 128>}, {transform_indices = @transform_4, window_bounds = array<i64: 8, 128>}]} {
    %c0_i32 = arith.constant 0 : i32
    %0 = arith.cmpi eq, %arg1, %c0_i32 : i32
    %1 = arith.extui %0 : i1 to i32
    %c0_i32_0 = arith.constant 0 : i32
    %2 = arith.cmpi ne, %1, %c0_i32_0 : i32
    scf.if %2 {
      %cst_21 = arith.constant 0.000000e+00 : f32
      %18 = vector.broadcast %cst_21 : f32 to vector<8x1x32xf32>
      %c0_22 = arith.constant 0 : index
      %c0_23 = arith.constant 0 : index
      %c0_24 = arith.constant 0 : index
      %19 = vector.load %arg7[%c0_22, %c0_23, %c0_24] : memref<8x1x32xf32, #tpu.memory_space<vmem>>, vector<8x1x32xf32>
      tpu.vector_store %arg7[%c0_22, %c0_23, %c0_24], %18 {strides = array<i32>} : memref<8x1x32xf32, #tpu.memory_space<vmem>>, vector<8x1x32xf32>,
      %cst_25 = arith.constant 0.000000e+00 : f32
      %20 = vector.broadcast %cst_25 : f32 to vector<8x1x1xf32>
      %c0_26 = arith.constant 0 : index
      %c0_27 = arith.constant 0 : index
      %c0_28 = arith.constant 0 : index
      %21 = vector.load %arg8[%c0_26, %c0_27, %c0_28] : memref<8x1x1xf32, #tpu.memory_space<vmem>>, vector<8x1x1xf32>
      tpu.vector_store %arg8[%c0_26, %c0_27, %c0_28], %20 {strides = array<i32>} : memref<8x1x1xf32, #tpu.memory_space<vmem>>, vector<8x1x1xf32>,
    } else {
    }
    %c0 = arith.constant 0 : index
    %c0_1 = arith.constant 0 : index
    %c0_2 = arith.constant 0 : index
    %3 = vector.load %arg3[%c0, %c0_1, %c0_2] : memref<8x1x16xbf16, #tpu.memory_space<vmem>>, vector<8x1x16xbf16>
    %c0_3 = arith.constant 0 : index
    %c0_4 = arith.constant 0 : index
    %c0_5 = arith.constant 0 : index
    %4 = vector.load %arg7[%c0_3, %c0_4, %c0_5] : memref<8x1x32xf32, #tpu.memory_space<vmem>>, vector<8x1x32xf32>
    %c0_6 = arith.constant 0 : index
    %c0_7 = arith.constant 0 : index
    %c0_8 = arith.constant 0 : index
    %5 = vector.load %arg2[%c0_6, %c0_7, %c0_8] : memref<8x16x32xbf16, #tpu.memory_space<vmem>>, vector<8x16x32xbf16>
    "tpu.trace_start"() <{level = 10 : i32, message = "bqs,bsh->bqh"}> : () -> ()
    %cst = arith.constant dense<0.000000e+00> : vector<8x1x32xf32>
    %6 = tpu.matmul %3, %5, %cst {dimension_numbers = #tpu.dot_dimension_numbers<[2], [1], [1], [2], [0, 0, 0, 1, 1, 2], [0], [0]>} : vector<8x1x16xbf16>, vector<8x16x32xbf16>, vector<8x1x32xf32> -> vector<8x1x32xf32>
    "tpu.trace_stop"() : () -> ()
    %7 = arith.addf %4, %6 : vector<8x1x32xf32>
    %c0_9 = arith.constant 0 : index
    %c0_10 = arith.constant 0 : index
    %c0_11 = arith.constant 0 : index
    %8 = vector.load %arg7[%c0_9, %c0_10, %c0_11] : memref<8x1x32xf32, #tpu.memory_space<vmem>>, vector<8x1x32xf32>
    tpu.vector_store %arg7[%c0_9, %c0_10, %c0_11], %7 {strides = array<i32>} : memref<8x1x32xf32, #tpu.memory_space<vmem>>, vector<8x1x32xf32>,
    %c0_12 = arith.constant 0 : index
    %c0_13 = arith.constant 0 : index
    %c0_14 = arith.constant 0 : index
    %9 = vector.load %arg8[%c0_12, %c0_13, %c0_14] : memref<8x1x1xf32, #tpu.memory_space<vmem>>, vector<8x1x1xf32>
    %10 = arith.extf %3 : vector<8x1x16xbf16> to vector<8x1x16xf32>
    %cst_15 = arith.constant dense<0.000000e+00> : vector<8x1xf32>
    %11 = vector.multi_reduction <add>, %10, %cst_15 [2] : vector<8x1x16xf32> to vector<8x1xf32>
    %12 = vector.shape_cast %11 : vector<8x1xf32> to vector<8x1x1xf32>
    %13 = arith.addf %9, %12 : vector<8x1x1xf32>
    %c0_16 = arith.constant 0 : index
    %c0_17 = arith.constant 0 : index
    %c0_18 = arith.constant 0 : index
    %14 = vector.load %arg8[%c0_16, %c0_17, %c0_18] : memref<8x1x1xf32, #tpu.memory_space<vmem>>, vector<8x1x1xf32>
    tpu.vector_store %arg8[%c0_16, %c0_17, %c0_18], %13 {strides = array<i32>} : memref<8x1x1xf32, #tpu.memory_space<vmem>>, vector<8x1x1xf32>,
    %c0_i32_19 = arith.constant 0 : i32
    %15 = arith.cmpi eq, %arg1, %c0_i32_19 : i32
    %16 = arith.extui %15 : i1 to i32
    %c0_i32_20 = arith.constant 0 : i32
    %17 = arith.cmpi ne, %16, %c0_i32_20 : i32
    scf.if %17 {
      %c0_21 = arith.constant 0 : index
      %c0_22 = arith.constant 0 : index
      %c0_23 = arith.constant 0 : index
      %18 = vector.load %arg8[%c0_21, %c0_22, %c0_23] : memref<8x1x1xf32, #tpu.memory_space<vmem>>, vector<8x1x1xf32>
      %cst_24 = arith.constant 9.99999971E-10 : f32
      %19 = vector.broadcast %cst_24 : f32 to vector<8x1x1xf32>
      %20 = arith.maximumf %18, %19 : vector<8x1x1xf32>
      %c0_25 = arith.constant 0 : index
      %c0_26 = arith.constant 0 : index
      %c0_27 = arith.constant 0 : index
      %21 = vector.load %arg7[%c0_25, %c0_26, %c0_27] : memref<8x1x32xf32, #tpu.memory_space<vmem>>, vector<8x1x32xf32>
      %22 = vector.broadcast %20 : vector<8x1x1xf32> to vector<8x1x32xf32>
      %23 = arith.divf %21, %22 : vector<8x1x32xf32>
      %cst_28 = arith.constant dense<0.000000e+00> : vector<8x32xf32>
      %24 = vector.multi_reduction <add>, %23, %cst_28 [1] : vector<8x1x32xf32> to vector<8x32xf32>
      %25 = arith.truncf %24 : vector<8x32xf32> to vector<8x32xbf16>
      %c0_29 = arith.constant 0 : index
      %c0_30 = arith.constant 0 : index
      %26 = vector.load %arg4[%c0_29, %c0_30] : memref<32x128xbf16, #tpu.memory_space<vmem>>, vector<32x128xbf16>
      %cst_31 = arith.constant dense<0.000000e+00> : vector<8x128xf32>
      %27 = tpu.matmul %25, %26, %cst_31 {dimension_numbers = #tpu.dot_dimension_numbers<[1], [0], [0], [1], [0, 0, 1, 1], [], []>} : vector<8x32xbf16>, vector<32x128xbf16>, vector<8x128xf32> -> vector<8x128xf32>
      %c0_32 = arith.constant 0 : index
      %c0_33 = arith.constant 0 : index
      %28 = vector.load %arg5[%c0_32, %c0_33] : memref<1x128xf32, #tpu.memory_space<vmem>>, vector<1x128xf32>
      %29 = vector.broadcast %28 : vector<1x128xf32> to vector<8x128xf32>
      %30 = arith.addf %27, %29 : vector<8x128xf32>
      %c0_34 = arith.constant 0 : index
      %c0_35 = arith.constant 0 : index
      %31 = vector.load %arg6[%c0_34, %c0_35] : memref<8x128xf32, #tpu.memory_space<vmem>>, vector<8x128xf32>
      tpu.vector_store %arg6[%c0_34, %c0_35], %30 {strides = array<i32>} : memref<8x128xf32, #tpu.memory_space<vmem>>, vector<8x128xf32>,
    } else {
    }
    return
  }
  func.func @transform_0(%arg0: i32, %arg1: i32) -> (i32, i32, i32) {
    %c0_i32 = arith.constant 0 : i32
    %c0_i32_0 = arith.constant 0 : i32
    return %arg0, %arg1, %c0_i32 : i32, i32, i32
  }
  func.func @transform_1(%arg0: i32, %arg1: i32) -> (i32, i32, i32) {
    %c0_i32 = arith.constant 0 : i32
    %c0_i32_0 = arith.constant 0 : i32
    return %arg0, %c0_i32, %arg1 : i32, i32, i32
  }
  func.func @transform_2(%arg0: i32, %arg1: i32) -> (i32, i32) {
    %c0_i32 = arith.constant 0 : i32
    %c0_i32_0 = arith.constant 0 : i32
    %c0_i32_1 = arith.constant 0 : i32
    return %c0_i32, %c0_i32_0 : i32, i32
  }
  func.func @transform_3(%arg0: i32, %arg1: i32) -> (i32, i32) {
    %c0_i32 = arith.constant 0 : i32
    %c0_i32_0 = arith.constant 0 : i32
    %c0_i32_1 = arith.constant 0 : i32
    return %c0_i32, %c0_i32_0 : i32, i32
  }
  func.func @transform_4(%arg0: i32, %arg1: i32) -> (i32, i32) {
    %c0_i32 = arith.constant 0 : i32
    %c0_i32_0 = arith.constant 0 : i32
    return %arg0, %c0_i32 : i32, i32
  }
}

</mosaic_0001>

<bundles_post_ra>
// kernel: tpu_custom_call.1
= control target key start
LH: loop header
LB: loop body
LE: loop exit
PB: predicated region body
PF: predicated region fallthrough
CT: control target
= control target key end

     0   :  { %9 = vsyncpa [#allocation5], 0  ;;  %s1180_s0 = inlined_call_operand.hbm [shape: bf16[8,16,32], index: 0, kind: input, shape index: {}]   ;;  %s1181_s1 = inlined_call_operand.vmem [shape: bf16[8,1,16], index: 1, kind: input, shape index: {}]   ;;  %s1182_s2 = inlined_call_operand.hbm [shape: bf16[32,128], index: 2, kind: input, shape index: {}]   ;;  %s1183_s3 = inlined_call_operand.vmem [shape: f32[1,128], index: 3, kind: input, shape index: {}]   ;;  %s1184_s4 = inlined_call_operand.hbm [shape: f32[8,128], index: 4, kind: output, shape index: {}]  }
   0x1   :  { %10 = vsyncpa [#allocation8], 0 }
   0x2   :  { %11 = vsyncpa [#allocation6], 0  ;;  %s1019_s15 = smov [#allocation4]  }
   0x3   :  { %s17_s16 = sshll.u32 %s1019_s15, 4  ;;  %s18_s16 = int_to_ptr.vmem [resolvable:$true] %s17_s16 }
   0x4   :  { %s961_s17 = scalar_lea.vmem %s18_s16, 1024  ;;  %p966_p1 = scmp.lt.s32.totalorder %s18_s16, %s18_s16 }
   0x5   :  { %p962_p0 = scmp.ne.s32.totalorder %s18_s16, %s961_s17  ;;  %p967_p2 = scmp.lt.s32.totalorder %s961_s17, %s961_s17 }
   0x7   :  { %p968_p3 = por %p967_p2, %p966_p1 }
   0x9   :  { %p969_p4 = pnand %p968_p3, %p962_p0 }
   0xb   :  { %972 = shalt.err (!%p969_p4)
}
   0xc   :  { %s1020_s18 = smov 64   ;;  %s1021_s19 = smov 4  }
   0xd   :  { %23 = dma.hbm_to_vmem [thread:$0]  %s1180_s0, 1024, %s18_s16, [#allocation5], %s1020_s18, %s1020_s18, %s1021_s19  }
   0xe   :  { %s1022_s22 = smov [#allocation7]  }
   0xf   :  { %s31_s23 = sshll.u32 %s1022_s22, 4  ;;  %s32_s23 = int_to_ptr.vmem [resolvable:$true] %s31_s23 }
  0x10   :  { %s981_s24 = scalar_lea.vmem %s32_s23, 256  ;;  %p986_p6 = scmp.lt.s32.totalorder %s32_s23, %s32_s23 }
  0x11   :  { %p982_p5 = scmp.ne.s32.totalorder %s32_s23, %s981_s24  ;;  %p987_p7 = scmp.lt.s32.totalorder %s981_s24, %s981_s24 }
  0x13   :  { %p988_p8 = por %p987_p7, %p986_p6 }
  0x15   :  { %p989_p9 = pnand %p988_p8, %p982_p5 }
  0x17   :  { %992 = shalt.err (!%p989_p9)
}
  0x18   :  { %37 = dma.hbm_to_vmem [thread:$0]  %s1182_s2, 256, %s32_s23, [#allocation8], %s1020_s18, %s1020_s18, %s1021_s19  }
  0x19   :  { %1013 = dma.done.wait [#allocation5], 1024  }
  0x1a   :  { %1014 = vsyncadd [#allocation5], 4294966272 }
  0x1b   :  { %1015 = dma.done.wait [#allocation8], 256  }
  0x1c   :  { %1016 = vsyncadd [#allocation8], 4294967040  ;;  %v1023_v0 = vmov 0.0   ;;  %vm60_vm0 = vcmask 0   ;;  %vm1024_vm1 = vmmov 0   ;;  %vm527_vm2 = vcmask 122880  }
  0x1d   :  { %861 = vmatprep.subr.bf16.mxu0 %v1023_v0  ;;  %867 = vmatprep.subr.bf16.mxu1 %v1023_v0  ;;  %62 = vst.msk [vmem:[#allocation3 + $0x1] sm:$0x1] %vm60_vm0, %v1023_v0  ;;  %61 = vst.msk [vmem:[#allocation3] sm:$0x1] %vm60_vm0, %v1023_v0  ;;  %v70_v1 = vld [vmem:[%s1181_s1 + $0x1] sm:$0x1] }
  0x1e   :  { %863 = vmatprep.mubr.msk.bf16.mxu0 %vm1024_vm1, %v1023_v0  ;;  %869 = vmatprep.mubr.msk.bf16.mxu1 %vm1024_vm1, %v1023_v0  ;;  %63 = vst.msk [vmem:[#allocation3 + $0x2] sm:$0x1] %vm60_vm0, %v1023_v0  ;;  %64 = vst.msk [vmem:[#allocation3 + $0x3] sm:$0x1] %vm60_vm0, %v1023_v0  ;;  %v71_v2 = vld [vmem:[%s1181_s1 + $0x2] sm:$0x1]  ;;  %v520_v4 = vunpack.c.l.bf16 %v70_v1 }
  0x1f   :  { %65 = vst.msk [vmem:[#allocation3 + $0x4] sm:$0x1] %vm60_vm0, %v1023_v0  ;;  %66 = vst.msk [vmem:[#allocation3 + $0x5] sm:$0x1] %vm60_vm0, %v1023_v0  ;;  %v69_v3 = vld [vmem:[%s1181_s1] sm:$0x1]  ;;  %v521_v5 = vunpack.c.l.bf16 %v71_v2 }
  0x20   :  { %67 = vst.msk [vmem:[#allocation3 + $0x6] sm:$0x1] %vm60_vm0, %v1023_v0  ;;  %68 = vst.msk [vmem:[#allocation3 + $0x7] sm:$0x1] %vm60_vm0, %v1023_v0  ;;  %v519_v6 = vunpack.c.l.bf16 %v69_v3  ;;  %v72_v7 = vld [vmem:[%s1181_s1 + $0x3] sm:$0x1] }
  0x21   :  { %v522_v8 = vunpack.c.l.bf16 %v72_v7  ;;  %v73_v9 = vld [vmem:[%s1181_s1 + $0x4] sm:$0x1]  ;;  %v74_v10 = vld [vmem:[%s1181_s1 + $0x5] sm:$0x1]  ;;  %v531_v11 = vsel %vm527_vm2, %v520_v4, 0.0  ;;  %v927_v13 = vld [vmem:[#allocation4] sm:$0xff]  }
  0x22   :  { %v528_v12 = vsel %vm527_vm2, %v519_v6, 0.0  ;;  %532 = vadd.xlane.f32.xlu0 %v531_v11  ;;  %v534_v14 = vsel %vm527_vm2, %v521_v5, 0.0  ;;  %v75_v15 = vld [vmem:[%s1181_s1 + $0x6] sm:$0x1]  ;;  %v76_v16 = vld [vmem:[%s1181_s1 + $0x7] sm:$0x1]  ;;  %v523_v19 = vunpack.c.l.bf16 %v73_v9  ;;  %v524_v20 = vunpack.c.l.bf16 %v74_v10  ;;  %862 = vmatpush3.bf16.msra.mxu0 %v927_v13 }
  0x23   :  { %529 = vadd.xlane.f32.xlu1 %v528_v12  ;;  %v928_v17 = vld [vmem:[#allocation4 + $0x8] sm:$0xff]   ;;  %v537_v18 = vsel %vm527_vm2, %v522_v8, 0.0  ;;  %v929_v21 = vld [vmem:[#allocation4 + $0x10] sm:$0xff]   ;;  %vm107_vm3 = vcmask 130048   ;;  %873 = vmatprep.subr.bf16.mxu0 %v1023_v0  ;;  %v930_v22 = vld [vmem:[#allocation4 + $0x18] sm:$0xff]   ;;  %v525_v25 = vunpack.c.l.bf16 %v75_v15  ;;  %v526_v26 = vunpack.c.l.bf16 %v76_v16  ;;  %s1026_s16 = smov [#allocation9]  }
  0x24   :  { %868 = vmatpush3.bf16.msra.mxu1 %v928_v17  ;;  %v540_v23 = vsel %vm527_vm2, %v523_v19, 0.0  ;;  %v543_v24 = vsel %vm527_vm2, %v524_v20, 0.0  ;;  %v931_v29 = vld [vmem:[#allocation4 + $0x20] sm:$0xff]   ;;  %v932_v30 = vld [vmem:[#allocation4 + $0x28] sm:$0xff]   ;;  %v1025_v31 = vmov 0   ;;  %v933_v32 = vld [vmem:[#allocation4 + $0x30] sm:$0xff]  }
  0x25   :  { %879 = vmatprep.subr.bf16.mxu1 %v1023_v0  ;;  %864 = vmatmul.mubr.msk.bf16.vlgmr.msra.gmra.mxu0 %vm107_vm3, %v69_v3  ;;  %v546_v27 = vsel %vm527_vm2, %v525_v25, 0.0  ;;  %v549_v28 = vsel %vm527_vm2, %v526_v26, 0.0  ;;  %v934_v33 = vld [vmem:[#allocation4 + $0x38] sm:$0xff]   ;;  %vm51_vm4 = vcmask 253952   ;;  %v935_v11 = vld [vmem:[#allocation7 + $0x8] sm:$0xff]   ;;  %vm728_vm5 = vcmask 1041409  }
  0x26   :  { %535 = vadd.xlane.f32.xlu0 %v534_v14  ;;  %874 = vmatpush3.bf16.msra.mxu0 %v929_v21  ;;  %v512_v34 = vld [vmem:[#allocation3 + $0x1] sm:$0x1]  ;;  %v511_v35 = vld [vmem:[#allocation3] sm:$0x1]  ;;  %v513_v40 = vld [vmem:[#allocation3 + $0x2] sm:$0x1] }
  0x27   :  { %538 = vadd.xlane.f32.xlu1 %v537_v18  ;;  %870 = vmatmul.mubr.msk.bf16.vlgmr.msra.gmra.mxu1 %vm107_vm3, %v70_v1  ;;  %v514_v41 = vld [vmem:[#allocation3 + $0x3] sm:$0x1]  ;;  %v515_v46 = vld [vmem:[#allocation3 + $0x4] sm:$0x1]  ;;  %v516_v47 = vld [vmem:[#allocation3 + $0x5] sm:$0x1] }
  0x28   :  { %875 = vmatprep.mubr.msk.bf16.mxu0 %vm1024_vm1, %v1023_v0  ;;  %880 = vmatpush3.bf16.msra.mxu1 %v930_v22  ;;  %52 = vst.msk [vmem:[#allocation2] sm:$0x1] %vm51_vm4, %v1023_v0  ;;  %53 = vst.msk [vmem:[#allocation2 + $0x1] sm:$0x1] %vm51_vm4, %v1023_v0  ;;  %v517_v53 = vld [vmem:[#allocation3 + $0x6] sm:$0x1] }
  0x29   :  { %881 = vmatprep.mubr.msk.bf16.mxu1 %vm1024_vm1, %v1023_v0  ;;  %885 = vmatprep.subr.bf16.mxu0 %v1023_v0  ;;  %54 = vst.msk [vmem:[#allocation2 + $0x2] sm:$0x1] %vm51_vm4, %v1023_v0  ;;  %55 = vst.msk [vmem:[#allocation2 + $0x3] sm:$0x1] %vm51_vm4, %v1023_v0  ;;  %v518_v54 = vld [vmem:[#allocation3 + $0x7] sm:$0x1] }
  0x2a   :  { %541 = vadd.xlane.f32.xlu0 %v540_v23  ;;  %891 = vmatprep.subr.bf16.mxu1 %v1023_v0  ;;  %56 = vst.msk [vmem:[#allocation2 + $0x4] sm:$0x1] %vm51_vm4, %v1023_v0  ;;  %57 = vst.msk [vmem:[#allocation2 + $0x5] sm:$0x1] %vm51_vm4, %v1023_v0  ;;  %v936_v14 = vld [vmem:[#allocation7] sm:$0xff]   ;;  %vm731_vm6 = vcmask 1042434  }
  0x2b   :  { %544 = vadd.xlane.f32.xlu1 %v543_v24  ;;  %925 = vset.pattern.permute.xlu0 %v1025_v31  ;;  %58 = vst.msk [vmem:[#allocation2 + $0x6] sm:$0x1] %vm51_vm4, %v1023_v0  ;;  %59 = vst.msk [vmem:[#allocation2 + $0x7] sm:$0x1] %vm51_vm4, %v1023_v0  ;;  %vm734_vm7 = vcmask 1043459   ;;  %vm737_vm8 = vcmask 1044484  }
  0x2c   :  { %926 = vset.pattern.permute.xlu1 %v1025_v31  ;;  %vm740_vm9 = vcmask 1045509   ;;  %vm743_vm10 = vcmask 1046534   ;;  %vm746_vm11 = vcmask 1047559   ;;  %vm761_vm12 = vcmask 261120   ;;  %s812_s17 = sshll.u32 %s1026_s16, 4  ;;  %s813_s17 = int_to_ptr.vmem [resolvable:$true] %s812_s17 }
  0x2d   :  { %876 = vmatmul.mubr.msk.bf16.vlgmr.msra.gmra.mxu0 %vm107_vm3, %v71_v2  ;;  %s993_s18 = scalar_lea.vmem %s813_s17, 128  ;;  %p998_p11 = scmp.lt.s32.totalorder %s813_s17, %s813_s17 }
  0x2e   :  { %547 = vadd.xlane.f32.xlu0 %v546_v27  ;;  %886 = vmatpush3.bf16.msra.mxu0 %v931_v29  ;;  %p994_p10 = scmp.ne.s32.totalorder %s813_s17, %s993_s18  ;;  %p999_p12 = scmp.lt.s32.totalorder %s993_s18, %s993_s18 }
  0x2f   :  { %550 = vadd.xlane.f32.xlu1 %v549_v28  ;;  %882 = vmatmul.mubr.msk.bf16.vlgmr.msra.gmra.mxu1 %vm107_vm3, %v72_v7  ;;  %v77_v12 = vld [vmem:[#allocation2] sm:$0x1]  ;;  %v78_v13 = vld [vmem:[#allocation2 + $0x1] sm:$0x1] }
  0x30   :  { %892 = vmatpush3.bf16.msra.mxu1 %v932_v30  ;;  %887 = vmatprep.mubr.msk.bf16.mxu0 %vm1024_vm1, %v1023_v0  ;;  %v79_v25 = vld [vmem:[#allocation2 + $0x2] sm:$0x1]  ;;  %v80_v26 = vld [vmem:[#allocation2 + $0x3] sm:$0x1]  ;;  %p1000_p13 = por %p999_p12, %p998_p11 }
  0x31   :  { %893 = vmatprep.mubr.msk.bf16.mxu1 %vm1024_vm1, %v1023_v0  ;;  %897 = vmatprep.subr.bf16.mxu0 %v1023_v0 }
  0x32   :  { %903 = vmatprep.subr.bf16.mxu1 %v1023_v0  ;;  %p1001_p0 = pnand %p1000_p13, %p994_p10 }
  0x35   :  { %888 = vmatmul.mubr.msk.bf16.vlgmr.msra.gmra.mxu0 %vm107_vm3, %v73_v9 }
  0x36   :  { %898 = vmatpush3.bf16.msra.mxu0 %v933_v32  ;;  %899 = vmatprep.mubr.msk.bf16.mxu0 %vm1024_vm1, %v1023_v0 }
  0x37   :  { %894 = vmatmul.mubr.msk.bf16.vlgmr.msra.gmra.mxu1 %vm107_vm3, %v74_v10  ;;  %909 = vmatprep.subr.bf16.mxu0 %v1023_v0 }
  0x38   :  { %904 = vmatpush3.bf16.msra.mxu1 %v934_v33  ;;  %905 = vmatprep.mubr.msk.bf16.mxu1 %vm1024_vm1, %v1023_v0 }
  0x3d   :  { %900 = vmatmul.mubr.msk.bf16.vlgmr.msra.gmra.mxu0 %vm107_vm3, %v75_v15 }
  0x3e   :  { %913 = vmatprep.mubr.msk.bf16.mxu0 %vm1024_vm1, %v1023_v0  ;;  %910 = vmatpush3.bf16.msra.mxu0 %v935_v11 }
  0x3f   :  { %906 = vmatmul.mubr.msk.bf16.vlgmr.msra.gmra.mxu1 %vm107_vm3, %v76_v16  ;;  %911 = vmatprep.subr.bf16.mxu0 %v1023_v0 }
  0x42   :  { %912 = vmatpush3.bf16.msra.mxu0 %v936_v14 }
  0xab   :  { %v533_v36 = vpop.xlane.xlu0 %532 }
  0xac   :  { %v530_v37 = vpop.xlane.xlu1 %529  ;;  %v553_v38 = vadd.f32 %v533_v36, %v512_v34  ;;  %v81_v36 = vld [vmem:[#allocation2 + $0x4] sm:$0x1] }
  0xad   :  { %v552_v39 = vadd.f32 %v530_v37, %v511_v35  ;;  %v82_v37 = vld [vmem:[#allocation2 + $0x5] sm:$0x1] }
  0xae   :  { %562 = vst.msk [vmem:[#allocation3 + $0x1] sm:$0x1] %vm60_vm0, %v553_v38 }
  0xaf   :  { %561 = vst.msk [vmem:[#allocation3] sm:$0x1] %vm60_vm0, %v552_v39  ;;  %v536_v42 = vpop.xlane.xlu0 %535 }
  0xb0   :  { %v539_v43 = vpop.xlane.xlu1 %538  ;;  %v554_v44 = vadd.f32 %v536_v42, %v513_v40 }
  0xb1   :  { %v555_v45 = vadd.f32 %v539_v43, %v514_v41 }
  0xb2   :  { %563 = vst.msk [vmem:[#allocation3 + $0x2] sm:$0x1] %vm60_vm0, %v554_v44 }
  0xb3   :  { %564 = vst.msk [vmem:[#allocation3 + $0x3] sm:$0x1] %vm60_vm0, %v555_v45  ;;  %v542_v48 = vpop.xlane.xlu0 %541 }
  0xb4   :  { %v545_v49 = vpop.xlane.xlu1 %544  ;;  %v556_v50 = vadd.f32 %v542_v48, %v515_v46  ;;  %v83_v48 = vld [vmem:[#allocation2 + $0x6] sm:$0x1] }
  0xb5   :  { %v557_v51 = vadd.f32 %v545_v49, %v516_v47  ;;  %v573_v52 = vld [vmem:[#allocation3 + $0x1] sm:$0x1]  ;;  %v84_v49 = vld [vmem:[#allocation2 + $0x7] sm:$0x1] }
  0xb6   :  { %v581_v55 = vmax.f32 %v573_v52, 1e-09  ;;  %565 = vst.msk [vmem:[#allocation3 + $0x4] sm:$0x1] %vm60_vm0, %v556_v50  ;;  %v572_v61 = vld [vmem:[#allocation3] sm:$0x1] }
  0xb7   :  { %566 = vst.msk [vmem:[#allocation3 + $0x5] sm:$0x1] %vm60_vm0, %v557_v51  ;;  %v548_v56 = vpop.xlane.xlu0 %547  ;;  %v580_v63 = vmax.f32 %v572_v61, 1e-09 }
  0xb8   :  { %v551_v57 = vpop.xlane.xlu1 %550  ;;  %607 = vperm.xlu0 %925, %v581_v55   ;;  %v558_v58 = vadd.f32 %v548_v56, %v517_v53 }
  0xb9   :  { %v559_v59 = vadd.f32 %v551_v57, %v518_v54  ;;  %v574_v60 = vld [vmem:[#allocation3 + $0x2] sm:$0x1] }
  0xba   :  { %v582_v62 = vmax.f32 %v574_v60, 1e-09  ;;  %567 = vst.msk [vmem:[#allocation3 + $0x6] sm:$0x1] %vm60_vm0, %v558_v58  ;;  %v575_v1 = vld [vmem:[#allocation3 + $0x3] sm:$0x1]  ;;  %v601_v60 = vlaneseq }
  0xbb   :  { %568 = vst.msk [vmem:[#allocation3 + $0x7] sm:$0x1] %vm60_vm0, %v559_v59  ;;  %v583_v2 = vmax.f32 %v575_v1, 1e-09 }
  0xbc   :  { %616 = vperm.xlu1 %926, %v582_v62   ;;  %v602_v61 = vshrl.u32 %v601_v60, 7 }
  0xbd   :  { %v576_v3 = vld [vmem:[#allocation3 + $0x4] sm:$0x1] }
  0xbe   :  { %v584_v4 = vmax.f32 %v576_v3, 1e-09  ;;  %v577_v5 = vld [vmem:[#allocation3 + $0x5] sm:$0x1] }
  0xbf   :  { %v585_v6 = vmax.f32 %v577_v5, 1e-09 }
  0xc0   :  { %598 = vperm.xlu1 %926, %v580_v63   ;;  %v603_v63 = vsub.s32 0, %v602_v61 }
  0xc1   :  { %v578_v7 = vld [vmem:[#allocation3 + $0x6] sm:$0x1] }
  0xc2   :  { %v586_v8 = vmax.f32 %v578_v7, 1e-09  ;;  %v579_v9 = vld [vmem:[#allocation3 + $0x7] sm:$0x1] }
  0xc3   :  { %v587_v10 = vmax.f32 %v579_v9, 1e-09 }
  0xc4   :  { %625 = vperm.xlu1 %926, %v583_v2  }
  0xc8   :  { %634 = vperm.xlu1 %926, %v584_v4  }
  0xcc   :  { %643 = vperm.xlu1 %926, %v585_v6  }
  0xd0   :  { %652 = vperm.xlu1 %926, %v586_v8  }
  0xd4   :  { %661 = vperm.xlu1 %926, %v587_v10  }
  0xe5   :  { %v145_v15 = vpop.f32.mrf.mxu0 }
  0xe6   :  { %v494_v17 = vadd.f32 %v145_v15, %v77_v12 }
  0xe7   :  { %v194_v16 = vpop.f32.mrf.mxu1  ;;  %v865_v19 = vpop.f32.mrf.mxu0 }
  0xe8   :  { %v495_v18 = vadd.f32 %v194_v16, %v78_v13  ;;  %503 = vst.msk [vmem:[#allocation2] sm:$0x1] %vm51_vm4, %v494_v17 }
  0xe9   :  { %v871_v20 = vpop.f32.mrf.mxu1  ;;  %v148_v21 = vpop.f32.mrf.mxu0 }
  0xea   :  { %504 = vst.msk [vmem:[#allocation2 + $0x1] sm:$0x1] %vm51_vm4, %v495_v18 }
  0xeb   :  { %v197_v22 = vpop.f32.mrf.mxu1  ;;  %v866_v23 = vpop.f32.mrf.mxu0 }
  0xed   :  { %v872_v24 = vpop.f32.mrf.mxu1  ;;  %v243_v27 = vpop.f32.mrf.mxu0 }
  0xee   :  { %v496_v28 = vadd.f32 %v243_v27, %v79_v25 }
  0xef   :  { %v292_v0 = vpop.f32.mrf.mxu1  ;;  %v877_v30 = vpop.f32.mrf.mxu0 }
  0xf0   :  { %v497_v29 = vadd.f32 %v292_v0, %v80_v26  ;;  %505 = vst.msk [vmem:[#allocation2 + $0x2] sm:$0x1] %vm51_vm4, %v496_v28  ;;  %v588_v26 = vld [vmem:[#allocation2] sm:$0x1] }
  0xf1   :  { %v883_v31 = vpop.f32.mrf.mxu1  ;;  %v246_v32 = vpop.f32.mrf.mxu0  ;;  %v589_v15 = vld [vmem:[#allocation2 + $0x1] sm:$0x1] }
  0xf2   :  { %506 = vst.msk [vmem:[#allocation2 + $0x3] sm:$0x1] %vm51_vm4, %v497_v29 }
  0xf3   :  { %v295_v33 = vpop.f32.mrf.mxu1  ;;  %v878_v34 = vpop.f32.mrf.mxu0 }
  0xf5   :  { %v884_v35 = vpop.f32.mrf.mxu1  ;;  %v341_v38 = vpop.f32.mrf.mxu0 }
  0xf6   :  { %v498_v40 = vadd.f32 %v341_v38, %v81_v36 }
  0xf7   :  { %v390_v39 = vpop.f32.mrf.mxu1  ;;  %v889_v42 = vpop.f32.mrf.mxu0  ;;  %v590_v23 = vld [vmem:[#allocation2 + $0x2] sm:$0x1] }
  0xf8   :  { %v499_v41 = vadd.f32 %v390_v39, %v82_v37  ;;  %507 = vst.msk [vmem:[#allocation2 + $0x4] sm:$0x1] %vm51_vm4, %v498_v40 }
  0xf9   :  { %v895_v43 = vpop.f32.mrf.mxu1  ;;  %v344_v44 = vpop.f32.mrf.mxu0  ;;  %v591_v20 = vld [vmem:[#allocation2 + $0x3] sm:$0x1] }
  0xfa   :  { %508 = vst.msk [vmem:[#allocation2 + $0x5] sm:$0x1] %vm51_vm4, %v499_v41 }
  0xfb   :  { %v393_v45 = vpop.f32.mrf.mxu1  ;;  %v890_v46 = vpop.f32.mrf.mxu0 }
  0xfd   :  { %v896_v47 = vpop.f32.mrf.mxu1  ;;  %v439_v50 = vpop.f32.mrf.mxu0 }
  0xfe   :  { %v500_v52 = vadd.f32 %v439_v50, %v83_v48 }
  0xff   :  { %v488_v51 = vpop.f32.mrf.mxu1  ;;  %v901_v54 = vpop.f32.mrf.mxu0  ;;  %v592_v24 = vld [vmem:[#allocation2 + $0x4] sm:$0x1] }
 0x100   :  { %v501_v53 = vadd.f32 %v488_v51, %v84_v49  ;;  %509 = vst.msk [vmem:[#allocation2 + $0x6] sm:$0x1] %vm51_vm4, %v500_v52 }
 0x101   :  { %v907_v55 = vpop.f32.mrf.mxu1  ;;  %v442_v56 = vpop.f32.mrf.mxu0  ;;  %v593_v29 = vld [vmem:[#allocation2 + $0x5] sm:$0x1] }
 0x102   :  { %510 = vst.msk [vmem:[#allocation2 + $0x7] sm:$0x1] %vm51_vm4, %v501_v53 }
 0x103   :  { %v491_v57 = vpop.f32.mrf.mxu1  ;;  %v902_v58 = vpop.f32.mrf.mxu0 }
 0x105   :  { %v908_v59 = vpop.f32.mrf.mxu1 }
 0x107   :  { %v594_v37 = vld [vmem:[#allocation2 + $0x6] sm:$0x1] }
 0x109   :  { %v595_v46 = vld [vmem:[#allocation2 + $0x7] sm:$0x1] }
 0x133   :  { %v608_v1 = vpop.permute.xlu0 %607 }
 0x134   :  { %v613_v3 = vrot.slane %v608_v1, %v603_v63 }
 0x136   :  { %937 = vrcp.f32 %v613_v3 }
 0x137   :  { %v617_v62 = vpop.permute.xlu1 %616 }
 0x138   :  { %v622_v7 = vrot.slane %v617_v62, %v603_v63 }
 0x13b   :  { %v599_v2 = vpop.permute.xlu1 %598 }
 0x13c   :  { %v604_v4 = vrot.slane %v599_v2, %v603_v63 }
 0x13e   :  { %939 = vrcp.f32 %v604_v4 }
 0x13f   :  { %v626_v5 = vpop.permute.xlu1 %625 }
 0x140   :  { %v631_v6 = vrot.slane %v626_v5, %v603_v63 }
 0x142   :  { %941 = vrcp.f32 %v631_v6 }
 0x143   :  { %v635_v8 = vpop.permute.xlu1 %634  ;;  %943 = vrcp.f32 %v622_v7  ;;  %v938_v14 = vpop.eup %937  ;;  %v838_v7 = vld [vmem:[%s1183_s3] ss:$0 sm:$0xff] }
 0x144   :  { %v640_v9 = vrot.slane %v635_v8, %v603_v63  ;;  %v671_v22 = vmul.f32 %v938_v14, %v589_v15 }
 0x146   :  { %945 = vrcp.f32 %v640_v9  ;;  %v693_v31 = vpack.c.bf16 %v671_v22, %v671_v22 }
 0x147   :  { %v644_v10 = vpop.permute.xlu1 %643 }
 0x148   :  { %v649_v11 = vrot.slane %v644_v10, %v603_v63  ;;  %v720_v39 = vunpack.c.l.b16 %v693_v31 }
 0x14a   :  { %947 = vrcp.f32 %v649_v11  ;;  %v727_v48 = vrot.slane %v720_v39, 7 }
 0x14b   :  { %v653_v12 = vpop.permute.xlu1 %652  ;;  %v940_v17 = vpop.eup %939 }
 0x14c   :  { %v658_v13 = vrot.slane %v653_v12, %v603_v63  ;;  %v669_v27 = vmul.f32 %v940_v17, %v588_v26 }
 0x14e   :  { %949 = vrcp.f32 %v658_v13  ;;  %v692_v33 = vpack.c.bf16 %v669_v27, %v669_v27 }
 0x14f   :  { %v662_v16 = vpop.permute.xlu1 %661  ;;  %v942_v19 = vpop.eup %941 }
 0x150   :  { %v667_v18 = vrot.slane %v662_v16, %v603_v63  ;;  %v944_v21 = vpop.eup %943  ;;  %v675_v0 = vmul.f32 %v942_v19, %v591_v20  ;;  %v719_v42 = vunpack.c.l.b16 %v692_v33 }
 0x151   :  { %v673_v28 = vmul.f32 %v944_v21, %v590_v23 }
 0x152   :  { %951 = vrcp.f32 %v667_v18  ;;  %v695_v34 = vpack.c.bf16 %v675_v0, %v675_v0  ;;  %v729_v52 = vsel %vm728_vm5, %v727_v48, %v719_v42 }
 0x153   :  { %v946_v25 = vpop.eup %945  ;;  %v694_v36 = vpack.c.bf16 %v673_v28, %v673_v28 }
 0x154   :  { %v677_v30 = vmul.f32 %v946_v25, %v592_v24  ;;  %v722_v43 = vunpack.c.l.b16 %v695_v34 }
 0x155   :  { %v721_v45 = vunpack.c.l.b16 %v694_v36 }
 0x156   :  { %v696_v38 = vpack.c.bf16 %v677_v30, %v677_v30  ;;  %v733_v53 = vrot.slane %v722_v43, 5 }
 0x157   :  { %v948_v32 = vpop.eup %947  ;;  %v730_v56 = vrot.slane %v721_v45, 6 }
 0x158   :  { %v679_v35 = vmul.f32 %v948_v32, %v593_v29  ;;  %v723_v47 = vunpack.c.l.b16 %v696_v38 }
 0x159   :  { %v732_v60 = vsel %vm731_vm6, %v730_v56, %v729_v52 }
 0x15a   :  { %v697_v40 = vpack.c.bf16 %v679_v35, %v679_v35  ;;  %v736_v57 = vrot.slane %v723_v47, 4  ;;  %v735_v62 = vsel %vm734_vm7, %v733_v53, %v732_v60 }
 0x15b   :  { %v950_v41 = vpop.eup %949 }
 0x15c   :  { %v681_v44 = vmul.f32 %v950_v41, %v594_v37  ;;  %v724_v49 = vunpack.c.l.b16 %v697_v40  ;;  %v738_v1 = vsel %vm737_vm8, %v736_v57, %v735_v62 }
 0x15e   :  { %v698_v50 = vpack.c.bf16 %v681_v44, %v681_v44  ;;  %v739_v58 = vrot.slane %v724_v49, 3 }
 0x15f   :  { %v952_v51 = vpop.eup %951 }
 0x160   :  { %v683_v54 = vmul.f32 %v952_v51, %v595_v46  ;;  %v725_v55 = vunpack.c.l.b16 %v698_v50  ;;  %v741_v3 = vsel %vm740_vm9, %v739_v58, %v738_v1 }
 0x162   :  { %v699_v59 = vpack.c.bf16 %v683_v54, %v683_v54  ;;  %v742_v61 = vrot.slane %v725_v55, 2 }
 0x164   :  { %v726_v63 = vunpack.c.l.b16 %v699_v59  ;;  %v744_v4 = vsel %vm743_vm10, %v742_v61, %v741_v3 }
 0x166   :  { %v745_v2 = vrot.slane %v726_v63, 1 }
 0x168   :  { %v747_v5 = vsel %vm746_vm11, %v745_v2, %v744_v4 }
 0x169   :  { %v748_v6 = vpack.c.b16 %v747_v5, %v747_v5 }
 0x16b   :  { %914 = vmatmul.mubr.msk.bf16.vlgmr.msra.gmra.mxu0 %vm761_vm12, %v748_v6 }
 0x22b   :  { %v799_v8 = vpop.f32.mrf.mxu0 }
 0x22c   :  { %v800_v9 = vadd.f32 %v838_v7, %v799_v8 }
 0x22d   :  { %v915_v10 = vpop.f32.mrf.mxu0 }
 0x22e   :  { %805 = vst [vmem:[#allocation9] sm:$0xff] %v800_v9 }
 0x22f   :  { %v802_v11 = vpop.f32.mrf.mxu0 }
 0x230   :  { %1004 = shalt.err (!%p1001_p0)
}
 0x231   :  { %815 = dma.vmem_to_hbm [thread:$0]  %s813_s17, 128, %s1184_s4, [#allocation6]   ;;  %v916_v12 = vpop.f32.mrf.mxu0 }
 0x232   :  { %1017 = dma.done.wait [#allocation6], 128  }
 0x233   :  { %1018 = vsyncadd [#allocation6], 4294967168 }
 0x234   :  { %819 = vsyncpa [#allocation5], 1 }
 0x235   :  { %820 = vsyncpa [#allocation8], 1 }
 0x236   :  { %821 = vsyncpa [#allocation6], 1 }

</bundles_post_ra>
